<compile_context>
chip_gen: v5e
topology: v5e:2x2
jax: 0.10.0
libtpu: 0.0.40
codegen_flags: <defaults>
</compile_context>

<pallas_src>
import jax
import jax.numpy as jnp
from jax import lax
from jax.experimental import pallas as pl
from jax.experimental.pallas import tpu as pltpu

LANE = 128
SUBLANE = 8
TARGET_BLOCK_ROWS = 8192   # 8192 * 128 * 4B = 4 MiB per f32 input block


def _round_up(x, m):
    return ((x + m - 1) // m) * m


def _row_align(*dtypes):
    # Native sublane tile: 8 rows for 32-bit, 16 for 16-bit, 32 for 8-bit.
    align = SUBLANE
    for dt in dtypes:
        itemsize = jnp.dtype(dt).itemsize
        align = max(align, SUBLANE * max(1, 4 // max(1, itemsize)))
    return align


def _num_core_splits():
    # The 2-way outer split only pays off where it lands on two real
    # TensorCores (v7x).  On single-TC chips keep a trivial size-1 axis.
    try:
        kind = jax.devices()[0].device_kind.lower()
    except Exception:
        return 1
    return 2 if ("v7" in kind or "7x" in kind) else 1


def _make_kernel(pos_weight, valid_rows, block_rows, blocks_per_split,
                 num_full_blocks):
    pw = float(pos_weight)
    folds = block_rows // SUBLANE

    def kernel(pred_ref, true_ref, loss_out_ref, mask_out_ref):
        c = pl.program_id(0)
        i = pl.program_id(1)

        # Output blocks are VMEM-resident accumulators across the inner axis.
        @pl.when(i == 0)
        def _():
            loss_out_ref[...] = jnp.zeros_like(loss_out_ref)
            mask_out_ref[...] = jnp.zeros_like(mask_out_ref)

        x = pred_ref[...].astype(jnp.float32)
        y = true_ref[...].astype(jnp.float32)

        # BCEWithLogitsLoss (reduction='none') with pos_weight p:
        #   loss = (1 - y) * x + (1 + (p - 1) * y) * softplus(-x)
        # stable softplus(-x) = max(-x, 0) + log1p(exp(-|x|))
        log_weight = 1.0 + (pw - 1.0) * y
        softplus_neg_x = jnp.maximum(-x, 0.0) + jnp.log1p(jnp.exp(-jnp.abs(x)))
        loss = (1.0 - y) * x + log_weight * softplus_neg_x

        def accumulate(valid):
            # where-select (not multiply) so garbage in OOB rows can never
            # poison the sum with NaN/Inf.
            loss_sel = jnp.where(valid, loss, 0.0)
            mask_f = valid.astype(jnp.float32)
            # Fold (block_rows, 128) -> (8, 128): pure VPU adds along the
            # leading axis, no per-step cross-lane reduce.
            loss_out_ref[...] += jnp.sum(
                loss_sel.reshape(folds, SUBLANE, LANE), axis=0)
            mask_out_ref[...] += jnp.sum(
                mask_f.reshape(folds, SUBLANE, LANE), axis=0)

        blk = c * blocks_per_split + i

        # Fast path (vast majority of blocks): fully inside the valid row
        # range, so the validity mask is just y >= 0 — no iota / index math.
        @pl.when(blk < num_full_blocks)
        def _():
            accumulate(y >= 0.0)

        # Slow path: partial last real block and phantom blocks from the
        # core split / block rounding — apply a row-level index mask.
        @pl.when(blk >= num_full_blocks)
        def _():
            row_ids = lax.broadcasted_iota(jnp.int32, (block_rows, LANE), 0)
            in_range = (blk * block_rows + row_ids) < valid_rows
            accumulate(in_range & (y >= 0.0))

    return kernel


def masked_bce_loss(y_pred, y_true, *, positive_class_weight=2.0, epsilon=1e-6):
    """Pallas-TPU equivalent of MaskedBCELoss.forward. Returns a scalar f32."""
    flat_p = jnp.reshape(y_pred, (-1,))   # native dtype: no wrapper upcast
    flat_t = jnp.reshape(y_true, (-1,))
    n = flat_p.shape[0]
    pw = float(positive_class_weight)

    # The 128-aligned prefix goes through the Pallas kernel; the <128-element
    # ragged tail (if any) is reduced directly in XLA below — no full-tensor
    # pad / extra HBM pass.
    rows = n // LANE
    n_main = rows * LANE

    loss_sum = jnp.float32(0.0)
    mask_sum = jnp.float32(0.0)

    if rows > 0:
        p2 = flat_p[:n_main].reshape(rows, LANE)
        t2 = flat_t[:n_main].reshape(rows, LANE)

        align = _row_align(flat_p.dtype, flat_t.dtype)
        block_rows = min(TARGET_BLOCK_ROWS, _round_up(rows, align))
        num_splits = _num_core_splits()

        nb = pl.cdiv(rows, block_rows)          # total row-blocks
        ni = pl.cdiv(nb, num_splits)            # row-blocks per core split
        grid = (num_splits, ni)
        num_full_blocks = rows // block_rows    # blocks needing no index mask

        def in_index_map(c, i):
            # Phantom trailing blocks re-read the last valid block; their
            # contribution is zeroed by the in-kernel row mask.
            return (jnp.minimum(c * ni + i, nb - 1), 0)

        kernel = _make_kernel(pw, rows, block_rows, ni, num_full_blocks)

        if num_splits == 2:
            dim_sem = (pltpu.CORE_PARALLEL, pltpu.ARBITRARY)  # real 2-TC split (v7x)
        else:
            dim_sem = ("arbitrary", "arbitrary")

        loss_part, mask_part = pl.pallas_call(
            kernel,
            out_shape=(
                jax.ShapeDtypeStruct((num_splits * SUBLANE, LANE), jnp.float32),
                jax.ShapeDtypeStruct((num_splits * SUBLANE, LANE), jnp.float32),
            ),
            grid_spec=pltpu.PrefetchScalarGridSpec(
                num_scalar_prefetch=0,
                grid=grid,
                in_specs=[
                    pl.BlockSpec((block_rows, LANE), in_index_map),
                    pl.BlockSpec((block_rows, LANE), in_index_map),
                ],
                out_specs=[
                    pl.BlockSpec((SUBLANE, LANE), lambda c, i: (c, 0)),
                    pl.BlockSpec((SUBLANE, LANE), lambda c, i: (c, 0)),
                ],
            ),
            compiler_params=pltpu.CompilerParams(
                dimension_semantics=dim_sem,
                vmem_limit_bytes=32 * 1024 * 1024,
            ),
        )(p2, t2)

        loss_sum = loss_sum + jnp.sum(loss_part)
        mask_sum = mask_sum + jnp.sum(mask_part)

    rem = n - n_main
    if rem:
        tx = flat_p[n_main:].astype(jnp.float32)
        ty = flat_t[n_main:].astype(jnp.float32)
        lw = 1.0 + (pw - 1.0) * ty
        sp = jnp.maximum(-tx, 0.0) + jnp.log1p(jnp.exp(-jnp.abs(tx)))
        tloss = (1.0 - ty) * tx + lw * sp
        tvalid = (ty >= 0.0).astype(jnp.float32)
        loss_sum = loss_sum + jnp.sum(tloss * tvalid)
        mask_sum = mask_sum + jnp.sum(tvalid)

    # Final scalar combine: sum(loss*mask) / (sum(mask) + eps), as in the module.
    return loss_sum / (mask_sum + epsilon)


def _reference(y_pred, y_true, positive_class_weight=2.0, epsilon=1e-6):
    x = jnp.reshape(y_pred, (-1,)).astype(jnp.float32)
    y = jnp.reshape(y_true, (-1,)).astype(jnp.float32)
    pw = positive_class_weight
    log_weight = 1.0 + (pw - 1.0) * y
    sp = jnp.maximum(-x, 0.0) + jnp.log1p(jnp.exp(-jnp.abs(x)))
    loss = (1.0 - y) * x + log_weight * sp
    mask = jnp.where(y >= 0.0, 1.0, 0.0)
    return jnp.sum(loss * mask) / (jnp.sum(mask) + epsilon)


if __name__ == "__main__":
    # Deterministic "config": positive_class_weight=2.0 (synthetic init)
    positive_class_weight = 2.0

    key = jax.random.PRNGKey(0)
    k1, k2, k3 = jax.random.split(key, 3)

    # Logits and targets, shapes consistent with a segmentation-style head.
    shape = (2, 4, 16, 16)
    y_pred = jax.random.normal(k1, shape, dtype=jnp.float32)
    # targets in {0, 1}, with some entries set to -1 (ignored / masked out)
    y_true = jax.random.bernoulli(k2, 0.3, shape).astype(jnp.float32)
    ignore = jax.random.bernoulli(k3, 0.2, shape)
    y_true = jnp.where(ignore, -1.0, y_true)

    loss = masked_bce_loss(
        y_pred, y_true, positive_class_weight=positive_class_weight, epsilon=1e-6
    )
    loss = jax.block_until_ready(loss)

    ref = _reference(y_pred, y_true, positive_class_weight, 1e-6)
    assert jnp.allclose(loss, ref, rtol=1e-5, atol=1e-5), (loss, ref)

    print("KERNEL_OK")
</pallas_src>

<mosaic_0001>
module attributes {stable_mosaic.version = 11 : i64} {
  func.func @kernel(%arg0: i32, %arg1: i32, %arg2: memref<16x128xf32, #tpu.memory_space<vmem>>, %arg3: memref<16x128xf32, #tpu.memory_space<vmem>>, %arg4: memref<8x128xf32, #tpu.memory_space<vmem>>, %arg5: memref<8x128xf32, #tpu.memory_space<vmem>>) attributes {dimension_semantics = [#tpu.dimension_semantics<arbitrary>, #tpu.dimension_semantics<arbitrary>], iteration_bounds = array<i64: 1, 1>, scalar_prefetch = 0 : i64, scratch_operands = 0 : i64, tpu.core_type = #tpu.core_type<tc>, window_params = [{transform_indices = @transform_0, window_bounds = array<i64: 16, 128>}, {transform_indices = @transform_1, window_bounds = array<i64: 16, 128>}, {transform_indices = @transform_2, window_bounds = array<i64: 8, 128>}, {transform_indices = @transform_3, window_bounds = array<i64: 8, 128>}]} {
    %c0_i32 = arith.constant 0 : i32
    %0 = arith.cmpi eq, %arg1, %c0_i32 : i32
    %1 = arith.extui %0 : i1 to i32
    %c0_i32_0 = arith.constant 0 : i32
    %2 = arith.cmpi ne, %1, %c0_i32_0 : i32
    scf.if %2 {
      %cst_13 = arith.constant 0.000000e+00 : f32
      %32 = vector.broadcast %cst_13 : f32 to vector<8x128xf32>
      %c0_14 = arith.constant 0 : index
      %c0_15 = arith.constant 0 : index
      %33 = vector.load %arg4[%c0_14, %c0_15] : memref<8x128xf32, #tpu.memory_space<vmem>>, vector<8x128xf32>
      tpu.vector_store %arg4[%c0_14, %c0_15], %32 {strides = array<i32>} : memref<8x128xf32, #tpu.memory_space<vmem>>, vector<8x128xf32>,
      %cst_16 = arith.constant 0.000000e+00 : f32
      %34 = vector.broadcast %cst_16 : f32 to vector<8x128xf32>
      %c0_17 = arith.constant 0 : index
      %c0_18 = arith.constant 0 : index
      %35 = vector.load %arg5[%c0_17, %c0_18] : memref<8x128xf32, #tpu.memory_space<vmem>>, vector<8x128xf32>
      tpu.vector_store %arg5[%c0_17, %c0_18], %34 {strides = array<i32>} : memref<8x128xf32, #tpu.memory_space<vmem>>, vector<8x128xf32>,
    } else {
    }
    %c0 = arith.constant 0 : index
    %c0_1 = arith.constant 0 : index
    %3 = vector.load %arg2[%c0, %c0_1] : memref<16x128xf32, #tpu.memory_space<vmem>>, vector<16x128xf32>
    %c0_2 = arith.constant 0 : index
    %c0_3 = arith.constant 0 : index
    %4 = vector.load %arg3[%c0_2, %c0_3] : memref<16x128xf32, #tpu.memory_space<vmem>>, vector<16x128xf32>
    %cst = arith.constant 1.000000e+00 : f32
    %5 = vector.broadcast %cst : f32 to vector<16x128xf32>
    %6 = arith.mulf %5, %4 : vector<16x128xf32>
    %cst_4 = arith.constant 1.000000e+00 : f32
    %7 = vector.broadcast %cst_4 : f32 to vector<16x128xf32>
    %8 = arith.addf %7, %6 : vector<16x128xf32>
    %cst_5 = arith.constant 0.000000e+00 : f32
    %9 = vector.broadcast %cst_5 : f32 to vector<16x128xf32>
    %10 = arith.subf %9, %3 : vector<16x128xf32>
    %cst_6 = arith.constant 0.000000e+00 : f32
    %11 = vector.broadcast %cst_6 : f32 to vector<16x128xf32>
    %12 = arith.maximumf %10, %11 : vector<16x128xf32>
    %13 = math.absf %3 : vector<16x128xf32>
    %cst_7 = arith.constant 0.000000e+00 : f32
    %14 = vector.broadcast %cst_7 : f32 to vector<16x128xf32>
    %15 = arith.subf %14, %13 : vector<16x128xf32>
    %16 = math.exp %15 : vector<16x128xf32>
    %17 = math.log1p %16 : vector<16x128xf32>
    %18 = arith.addf %12, %17 : vector<16x128xf32>
    %cst_8 = arith.constant 1.000000e+00 : f32
    %19 = vector.broadcast %cst_8 : f32 to vector<16x128xf32>
    %20 = arith.subf %19, %4 : vector<16x128xf32>
    %21 = arith.mulf %20, %3 : vector<16x128xf32>
    %22 = arith.mulf %8, %18 : vector<16x128xf32>
    %23 = arith.addf %21, %22 : vector<16x128xf32>
    %c1_i32 = arith.constant 1 : i32
    %24 = arith.muli %arg0, %c1_i32 : i32
    %25 = arith.addi %24, %arg1 : i32
    %c1_i32_9 = arith.constant 1 : i32
    %26 = arith.cmpi slt, %25, %c1_i32_9 : i32
    %27 = arith.extui %26 : i1 to i32
    %c0_i32_10 = arith.constant 0 : i32
    %28 = arith.cmpi ne, %27, %c0_i32_10 : i32
    scf.if %28 {
      %cst_13 = arith.constant 0.000000e+00 : f32
      %32 = vector.broadcast %cst_13 : f32 to vector<16x128xf32>
      %33 = arith.cmpf oge, %4, %32 : vector<16x128xf32>
      %cst_14 = arith.constant 0.000000e+00 : f32
      %34 = vector.broadcast %cst_14 : f32 to vector<16x128xf32>
      %35 = arith.select %33, %23, %34 : vector<16x128xi1>, vector<16x128xf32>
      %36 = arith.extui %33 : vector<16x128xi1> to vector<16x128xi32>
      %37 = arith.sitofp %36 : vector<16x128xi32> to vector<16x128xf32>
      %c0_15 = arith.constant 0 : index
      %c0_16 = arith.constant 0 : index
      %38 = vector.load %arg4[%c0_15, %c0_16] : memref<8x128xf32, #tpu.memory_space<vmem>>, vector<8x128xf32>
      %39 = vector.shape_cast %35 : vector<16x128xf32> to vector<2x8x128xf32>
      %cst_17 = arith.constant dense<0.000000e+00> : vector<8x128xf32>
      %40 = vector.multi_reduction <add>, %39, %cst_17 [0] : vector<2x8x128xf32> to vector<8x128xf32>
      %41 = arith.addf %38, %40 : vector<8x128xf32>
      %c0_18 = arith.constant 0 : index
      %c0_19 = arith.constant 0 : index
      %42 = vector.load %arg4[%c0_18, %c0_19] : memref<8x128xf32, #tpu.memory_space<vmem>>, vector<8x128xf32>
      tpu.vector_store %arg4[%c0_18, %c0_19], %41 {strides = array<i32>} : memref<8x128xf32, #tpu.memory_space<vmem>>, vector<8x128xf32>,
      %c0_20 = arith.constant 0 : index
      %c0_21 = arith.constant 0 : index
      %43 = vector.load %arg5[%c0_20, %c0_21] : memref<8x128xf32, #tpu.memory_space<vmem>>, vector<8x128xf32>
      %44 = vector.shape_cast %37 : vector<16x128xf32> to vector<2x8x128xf32>
      %cst_22 = arith.constant dense<0.000000e+00> : vector<8x128xf32>
      %45 = vector.multi_reduction <add>, %44, %cst_22 [0] : vector<2x8x128xf32> to vector<8x128xf32>
      %46 = arith.addf %43, %45 : vector<8x128xf32>
      %c0_23 = arith.constant 0 : index
      %c0_24 = arith.constant 0 : index
      %47 = vector.load %arg5[%c0_23, %c0_24] : memref<8x128xf32, #tpu.memory_space<vmem>>, vector<8x128xf32>
      tpu.vector_store %arg5[%c0_23, %c0_24], %46 {strides = array<i32>} : memref<8x128xf32, #tpu.memory_space<vmem>>, vector<8x128xf32>,
    } else {
    }
    %c1_i32_11 = arith.constant 1 : i32
    %29 = arith.cmpi sge, %25, %c1_i32_11 : i32
    %30 = arith.extui %29 : i1 to i32
    %c0_i32_12 = arith.constant 0 : i32
    %31 = arith.cmpi ne, %30, %c0_i32_12 : i32
    scf.if %31 {
      %32 = tpu.iota {dimensions = array<i32: 0>} : vector<16x128xi32>
      %c16_i32 = arith.constant 16 : i32
      %33 = arith.muli %25, %c16_i32 : i32
      %34 = vector.broadcast %33 : i32 to vector<16x128xi32>
      %35 = arith.addi %34, %32 : vector<16x128xi32>
      %c16_i32_13 = arith.constant 16 : i32
      %36 = vector.broadcast %c16_i32_13 : i32 to vector<16x128xi32>
      %37 = arith.cmpi slt, %35, %36 : vector<16x128xi32>
      %cst_14 = arith.constant 0.000000e+00 : f32
      %38 = vector.broadcast %cst_14 : f32 to vector<16x128xf32>
      %39 = arith.cmpf oge, %4, %38 : vector<16x128xf32>
      %40 = arith.andi %37, %39 : vector<16x128xi1>
      %cst_15 = arith.constant 0.000000e+00 : f32
      %41 = vector.broadcast %cst_15 : f32 to vector<16x128xf32>
      %42 = arith.select %40, %23, %41 : vector<16x128xi1>, vector<16x128xf32>
      %43 = arith.extui %40 : vector<16x128xi1> to vector<16x128xi32>
      %44 = arith.sitofp %43 : vector<16x128xi32> to vector<16x128xf32>
      %c0_16 = arith.constant 0 : index
      %c0_17 = arith.constant 0 : index
      %45 = vector.load %arg4[%c0_16, %c0_17] : memref<8x128xf32, #tpu.memory_space<vmem>>, vector<8x128xf32>
      %46 = vector.shape_cast %42 : vector<16x128xf32> to vector<2x8x128xf32>
      %cst_18 = arith.constant dense<0.000000e+00> : vector<8x128xf32>
      %47 = vector.multi_reduction <add>, %46, %cst_18 [0] : vector<2x8x128xf32> to vector<8x128xf32>
      %48 = arith.addf %45, %47 : vector<8x128xf32>
      %c0_19 = arith.constant 0 : index
      %c0_20 = arith.constant 0 : index
      %49 = vector.load %arg4[%c0_19, %c0_20] : memref<8x128xf32, #tpu.memory_space<vmem>>, vector<8x128xf32>
      tpu.vector_store %arg4[%c0_19, %c0_20], %48 {strides = array<i32>} : memref<8x128xf32, #tpu.memory_space<vmem>>, vector<8x128xf32>,
      %c0_21 = arith.constant 0 : index
      %c0_22 = arith.constant 0 : index
      %50 = vector.load %arg5[%c0_21, %c0_22] : memref<8x128xf32, #tpu.memory_space<vmem>>, vector<8x128xf32>
      %51 = vector.shape_cast %44 : vector<16x128xf32> to vector<2x8x128xf32>
      %cst_23 = arith.constant dense<0.000000e+00> : vector<8x128xf32>
      %52 = vector.multi_reduction <add>, %51, %cst_23 [0] : vector<2x8x128xf32> to vector<8x128xf32>
      %53 = arith.addf %50, %52 : vector<8x128xf32>
      %c0_24 = arith.constant 0 : index
      %c0_25 = arith.constant 0 : index
      %54 = vector.load %arg5[%c0_24, %c0_25] : memref<8x128xf32, #tpu.memory_space<vmem>>, vector<8x128xf32>
      tpu.vector_store %arg5[%c0_24, %c0_25], %53 {strides = array<i32>} : memref<8x128xf32, #tpu.memory_space<vmem>>, vector<8x128xf32>,
    } else {
    }
    return
  }
  func.func @transform_0(%arg0: i32, %arg1: i32) -> (i32, i32) {
    %c1_i32 = arith.constant 1 : i32
    %0 = arith.muli %arg0, %c1_i32 : i32
    %1 = arith.addi %0, %arg1 : i32
    %c0_i32 = arith.constant 0 : i32
    %2 = arith.minsi %1, %c0_i32 : i32
    %c0_i32_0 = arith.constant 0 : i32
    %c0_i32_1 = arith.constant 0 : i32
    return %2, %c0_i32_0 : i32, i32
  }
  func.func @transform_1(%arg0: i32, %arg1: i32) -> (i32, i32) {
    %c1_i32 = arith.constant 1 : i32
    %0 = arith.muli %arg0, %c1_i32 : i32
    %1 = arith.addi %0, %arg1 : i32
    %c0_i32 = arith.constant 0 : i32
    %2 = arith.minsi %1, %c0_i32 : i32
    %c0_i32_0 = arith.constant 0 : i32
    %c0_i32_1 = arith.constant 0 : i32
    return %2, %c0_i32_0 : i32, i32
  }
  func.func @transform_2(%arg0: i32, %arg1: i32) -> (i32, i32) {
    %c0_i32 = arith.constant 0 : i32
    %c0_i32_0 = arith.constant 0 : i32
    return %arg0, %c0_i32 : i32, i32
  }
  func.func @transform_3(%arg0: i32, %arg1: i32) -> (i32, i32) {
    %c0_i32 = arith.constant 0 : i32
    %c0_i32_0 = arith.constant 0 : i32
    return %arg0, %c0_i32 : i32, i32
  }
}

</mosaic_0001>

<bundles_post_ra>
// kernel: tpu_custom_call.1
= control target key start
LH: loop header
LB: loop body
LE: loop exit
PB: predicated region body
PF: predicated region fallthrough
CT: control target
= control target key end

     0   :  { %9 = vsyncpa [#allocation3], 0  ;;  %s375_s0 = inlined_call_operand.hbm [shape: f32[16,128], index: 0, kind: input, shape index: {}]   ;;  %s376_s1 = inlined_call_operand.hbm [shape: f32[16,128], index: 1, kind: input, shape index: {}]   ;;  %s377_s2 = inlined_call_operand.hbm [shape: f32[8,128], index: 2, kind: output, shape index: {0}]   ;;  %s378_s3 = inlined_call_operand.hbm [shape: f32[8,128], index: 3, kind: output, shape index: {1}]  }
   0x1   :  { %10 = vsyncpa [#allocation6], 0 }
   0x2   :  { %11 = vsyncpa [#allocation4], 0 }
   0x3   :  { %12 = vsyncpa [#allocation9], 0  ;;  %s23_s14 = sshll.u32 %s375_s0, 4  ;;  %s332_s15 = smov [#allocation2]   ;;  %s24_s14 = int_to_ptr.hbm [resolvable:$true] %s23_s14 }
   0x4   :  { %s25_s16 = sshll.u32 %s332_s15, 4  ;;  %s42_s19 = sshll.u32 %s376_s1, 4  ;;  %s26_s16 = int_to_ptr.vmem [resolvable:$true] %s25_s16  ;;  %s43_s19 = int_to_ptr.hbm [resolvable:$true] %s42_s19 }
   0x5   :  { %s333_s20 = smov 128   ;;  %s334_s21 = smov 8  }
   0x6   :  { %31 = dma.hbm_to_vmem [thread:$0]  %s24_s14, 256, %s26_s16, [#allocation3], %s333_s20, %s333_s20, %s334_s21  }
   0x7   :  { %s335_s22 = smov [#allocation5]  }
   0x8   :  { %s44_s23 = sshll.u32 %s335_s22, 4  ;;  %s45_s23 = int_to_ptr.vmem [resolvable:$true] %s44_s23 }
   0x9   :  { %50 = dma.hbm_to_vmem [thread:$0]  %s43_s19, 256, %s45_s23, [#allocation6], %s333_s20, %s333_s20, %s334_s21  }
   0xa   :  { %324 = dma.done.wait [#allocation3], 256  }
   0xb   :  { %325 = vsyncadd [#allocation3], 4294967040 }
   0xc   :  { %326 = dma.done.wait [#allocation6], 256  }
   0xd   :  { %327 = vsyncadd [#allocation6], 4294967040  ;;  %v73_v0 = vld [vmem:[#allocation2] sm:$0xff]  ;;  %v74_v1 = vld [vmem:[#allocation2 + $0x8] sm:$0xff]  ;;  %v336_v9 = vmov 0.0   ;;  %s337_s0 = smov [#allocation8]  }
   0xe   :  { %v83_v2 = vand.u32 2147483647, %v73_v0  ;;  %v75_v3 = vld [vmem:[#allocation5] sm:$0xff]  ;;  %v84_v4 = vand.u32 2147483647, %v74_v1  ;;  %v76_v5 = vld [vmem:[#allocation5 + $0x8] sm:$0xff] }
   0xf   :  { %vm124_vm0 = vcmp.ge.f32.partialorder %v75_v3, 0.0  ;;  %vm125_vm1 = vcmp.ge.f32.partialorder %v76_v5, 0.0  ;;  %s187_s1 = sshll.u32 %s337_s0, 4  ;;  %s189_s26 = sshll.u32 %s378_s3, 4  ;;  %v79_v21 = vsub.f32 0.0, %v73_v0  ;;  %v80_v24 = vsub.f32 0.0, %v74_v1  ;;  %s188_s1 = int_to_ptr.vmem [resolvable:$true] %s187_s1  ;;  %s190_s26 = int_to_ptr.hbm [resolvable:$true] %s189_s26 }
  0x10   :  { %v85_v6 = vsub.f32 0.0, %v83_v2  ;;  %v86_v7 = vsub.f32 0.0, %v84_v4  ;;  %v209_v10 = vsel %vm124_vm0, 1.0, %v336_v9  ;;  %v210_v11 = vsel %vm125_vm1, 1.0, %v336_v9  ;;  %s338_s3 = smov [#allocation7]   ;;  %s178_s30 = sshll.u32 %s377_s2, 4  ;;  %s179_s30 = int_to_ptr.hbm [resolvable:$true] %s178_s30 }
  0x11   :  { %v137_v13 = vadd.f32 %v210_v11, %v209_v10  ;;  %v81_v28 = vmax.f32 %v79_v21, 0.0  ;;  %v111_v30 = vsub.f32 1.0, %v75_v3  ;;  %v82_v32 = vmax.f32 %v80_v24, 0.0  ;;  %s176_s27 = sshll.u32 %s338_s3, 4  ;;  %s177_s27 = int_to_ptr.vmem [resolvable:$true] %s176_s27 }
  0x12   :  { %v87_v8 = vmul.f32 1.442695, %v85_v6  ;;  %v89_v12 = vmul.f32 1.442695, %v86_v7  ;;  %v112_v34 = vsub.f32 1.0, %v76_v5  ;;  %v77_v35 = vadd.f32 1.0, %v75_v3 }
  0x13   :  { %139 = vst [vmem:[#allocation8] sm:$0xff] %v137_v13  ;;  %v78_v37 = vadd.f32 1.0, %v76_v5  ;;  %v113_v41 = vmul.f32 %v111_v30, %v73_v0 }
  0x14   :  { %220 = vpow2.f32 %v87_v8  ;;  %192 = dma.vmem_to_hbm [thread:$0]  %s188_s1, 128, %s190_s26, [#allocation9]   ;;  %v114_v43 = vmul.f32 %v112_v34, %v74_v1 }
  0x15   :  { %222 = vpow2.f32 %v89_v12 }
  0x1a   :  { %v221_v14 = vpop.eup %220 }
  0x1b   :  { %v223_v15 = vpop.eup %222  ;;  %v91_v16 = vadd.f32 1.0, %v221_v14  ;;  %v94_v17 = vmul.f32 -0.5, %v221_v14  ;;  %v97_v22 = vand.u32 2147483647, %v221_v14 }
  0x1c   :  { %v100_v18 = vadd.f32 1.0, %v223_v15  ;;  %v103_v19 = vmul.f32 -0.5, %v223_v15  ;;  %v106_v25 = vand.u32 2147483647, %v223_v15 }
  0x1d   :  { %224 = vlog2.f32 %v91_v16  ;;  %v95_v20 = vadd.f32 1.0, %v94_v17  ;;  %vm98_vm2 = vcmp.lt.f32.partialorder %v97_v22, 0.0004427343 }
  0x1e   :  { %226 = vlog2.f32 %v100_v18  ;;  %v104_v23 = vadd.f32 1.0, %v103_v19  ;;  %vm107_vm3 = vcmp.lt.f32.partialorder %v106_v25, 0.0004427343 }
  0x1f   :  { %v96_v26 = vmul.f32 %v221_v14, %v95_v20 }
  0x20   :  { %v105_v29 = vmul.f32 %v223_v15, %v104_v23 }
  0x23   :  { %v225_v27 = vpop.eup %224 }
  0x24   :  { %v227_v31 = vpop.eup %226  ;;  %v93_v33 = vmul.f32 0.6931472, %v225_v27 }
  0x25   :  { %v102_v36 = vmul.f32 0.6931472, %v227_v31 }
  0x26   :  { %v99_v38 = vsel %vm98_vm2, %v96_v26, %v93_v33 }
  0x27   :  { %v108_v39 = vsel %vm107_vm3, %v105_v29, %v102_v36  ;;  %v109_v40 = vadd.f32 %v99_v38, %v81_v28 }
  0x28   :  { %v110_v42 = vadd.f32 %v108_v39, %v82_v32 }
  0x29   :  { %v115_v44 = vmul.f32 %v109_v40, %v77_v35 }
  0x2a   :  { %v116_v45 = vmul.f32 %v110_v42, %v78_v37 }
  0x2b   :  { %v117_v46 = vadd.f32 %v115_v44, %v113_v41 }
  0x2c   :  { %v118_v47 = vadd.f32 %v116_v45, %v114_v43 }
  0x2d   :  { %v126_v48 = vsel %vm124_vm0, %v117_v46, 0.0 }
  0x2e   :  { %v127_v49 = vsel %vm125_vm1, %v118_v47, 0.0 }
  0x2f   :  { %v133_v50 = vadd.f32 %v127_v49, %v126_v48 }
  0x31   :  { %135 = vst [vmem:[#allocation7] sm:$0xff] %v133_v50 }
  0x32   :  { %181 = dma.vmem_to_hbm [thread:$0]  %s177_s27, 128, %s179_s30, [#allocation4]  }
  0x33   :  { %328 = dma.done.wait [#allocation4], 128  }
  0x34   :  { %329 = vsyncadd [#allocation4], 4294967168 }
  0x35   :  { %330 = dma.done.wait [#allocation9], 128  }
  0x36   :  { %331 = vsyncadd [#allocation9], 4294967168 }
  0x37   :  { %201 = vsyncpa [#allocation3], 1 }
  0x38   :  { %202 = vsyncpa [#allocation6], 1 }
  0x39   :  { %203 = vsyncpa [#allocation4], 1 }
  0x3a   :  { %204 = vsyncpa [#allocation9], 1 }

</bundles_post_ra>
